<compile_context>
chip_gen: v5e
topology: v5e:2x2
jax: 0.10.0
libtpu: 0.0.40
codegen_flags: <defaults>
</compile_context>

<pallas_src>
import functools

import jax
import jax.numpy as jnp
from jax.experimental import pallas as pl
from jax.experimental.pallas import tpu as pltpu

HIDDEN = 10          # hidden_neurons in the PyTorch module
OUT = 6              # output_size in the PyTorch module
HP = 16              # hidden width padded to a sublane multiple (>= 10)
OP8 = 8              # output width padded to a sublane multiple (>= 6)
TM_DEFAULT = 2048    # batch lanes per grid step
_CHUNK = 512         # in-kernel sub-chunk (lanes) to bound vreg live ranges


def _state_nn_kernel(t_ref, w0_ref, b0_ref, w1_ref, b1_ref, w2_ref, b2_ref,
                     o_ref):
    """Batch on lanes.  t_ref: (1, TM); o_ref: (OP8, TM).

    w0_ref / b0_ref / b1_ref: (HP, 1); b2_ref: (OP8, 1).
    w1_ref: (HIDDEN, HP, 1)  -- w1_ref[m] is column m of the layer-2 weights.
    w2_ref: (HIDDEN, OP8, 1) -- w2_ref[m] is column m of the layer-3 weights.
    All padding rows/columns are zero, so padded sublanes stay exactly 0.
    """
    tm = o_ref.shape[-1]
    cw = _CHUNK if (tm > _CHUNK and tm % _CHUNK == 0) else tm

    w0 = w0_ref[...]                        # (HP, 1)
    b0 = b0_ref[...]                        # (HP, 1)
    b1 = b1_ref[...]                        # (HP, 1)
    b2 = b2_ref[...]                        # (OP8, 1)

    for s in range(0, tm, cw):              # static, unrolled sub-chunk loop
        x = t_ref[:, s:s + cw]              # (1, cw)   lane-dense load
        # Layer 1: broadcasted outer product == (t @ W0)^T, then tanh.
        h = jnp.tanh(w0 * x + b0)           # (HP, cw)
        # Layer 2: 10 unrolled broadcast-FMAs (VPU only, no MXU), then tanh.
        a = w1_ref[0] * h[0:1, :] + b1      # (HP, cw)
        for m in range(1, HIDDEN):
            a = a + w1_ref[m] * h[m:m + 1, :]
        h = jnp.tanh(a)                     # (HP, cw)
        # Layer 3 (linear): 10 unrolled broadcast-FMAs into (OP8, cw).
        o = w2_ref[0] * h[0:1, :] + b2      # (OP8, cw)
        for m in range(1, HIDDEN):
            o = o + w2_ref[m] * h[m:m + 1, :]
        o_ref[:, s:s + cw] = o              # lane-dense store


def _round_up(x, m):
    return ((x + m - 1) // m) * m


def _choose_tile(n, tm):
    """Batch lanes per grid step (always a multiple of 128)."""
    tm = max(128, _round_up(tm, 128))
    if n <= 256:
        return _round_up(max(n, 1), 128)                   # single small step
    if n <= 2 * tm:
        return min(tm, _round_up((n + 1) // 2, 128))       # >=2 steps (v7x)
    return tm


@functools.partial(jax.jit, static_argnames=("tm",))
def state_nn_forward(t, w0, b0, w1, b1, w2, b2, *, tm=TM_DEFAULT):
    """t: (N, 1) or (N,) float32, any N >= 1.  Returns (N, OUT) float32."""
    t_flat = t.reshape(-1).astype(jnp.float32)
    n = t_flat.shape[0]
    tm_eff = _choose_tile(n, tm)
    n_pad = _round_up(n, tm_eff)
    # Tail pad only (<= tm_eff-1 zeros); tanh keeps padded lanes finite and
    # they are sliced off below, so this is exact.
    t_row = jnp.pad(t_flat, (0, n_pad - n)).reshape(1, n_pad)

    full2 = lambda i: (0, 0)
    full3 = lambda i: (0, 0, 0)
    out = pl.pallas_call(
        _state_nn_kernel,
        out_shape=jax.ShapeDtypeStruct((OP8, n_pad), jnp.float32),
        grid=(n_pad // tm_eff,),
        in_specs=[
            pl.BlockSpec((1, tm_eff), lambda i: (0, i)),   # t row (lane-dense)
            pl.BlockSpec((HP, 1), full2),                  # W0 column
            pl.BlockSpec((HP, 1), full2),                  # b0
            pl.BlockSpec((HIDDEN, HP, 1), full3),          # W1 columns
            pl.BlockSpec((HP, 1), full2),                  # b1
            pl.BlockSpec((HIDDEN, OP8, 1), full3),         # W2 columns
            pl.BlockSpec((OP8, 1), full2),                 # b2
        ],
        out_specs=pl.BlockSpec((OP8, tm_eff), lambda i: (0, i)),
        compiler_params=pltpu.CompilerParams(
            dimension_semantics=("parallel",)),
    )(t_row, w0, b0, w1, b1, w2, b2)
    # (OP8, n_pad) -> (N, OUT): fused slice + transpose on the XLA side.
    return out[:OUT, :n].T


def _xavier_normal(key, fan_in, fan_out, gain):
    std = gain * jnp.sqrt(2.0 / (fan_in + fan_out))
    return std * jax.random.normal(key, (fan_in, fan_out), dtype=jnp.float32)


def make_params(seed=100):
    """Xavier-normal (tanh gain 5/3) weights, zero biases, in kernel layout.

    Math form: h1 = tanh(t @ A0 + 0); h2 = tanh(h1 @ A1 + 0); y = h2 @ A2 + 0
    with A = W_torch^T.  Kernel layout stores columns on sublanes, zero-padded.
    """
    # TODO(synk): exact torch.manual_seed(100) bit-reproduction of the init is
    # not possible in JAX; distribution & zero biases match the module spec.
    gain = 5.0 / 3.0
    key = jax.random.PRNGKey(seed)
    k0, k1, k2 = jax.random.split(key, 3)

    a0 = _xavier_normal(k0, 1, HIDDEN, gain)        # (1, 10)
    a1 = _xavier_normal(k1, HIDDEN, HIDDEN, gain)   # (10, 10)
    a2 = _xavier_normal(k2, HIDDEN, OUT, gain)      # (10, 6)

    w0 = jnp.zeros((HP, 1), jnp.float32).at[:HIDDEN, 0].set(a0[0])
    b0 = jnp.zeros((HP, 1), jnp.float32)
    w1 = jnp.zeros((HIDDEN, HP, 1), jnp.float32).at[:, :HIDDEN, 0].set(a1)
    b1 = jnp.zeros((HP, 1), jnp.float32)
    w2 = jnp.zeros((HIDDEN, OP8, 1), jnp.float32).at[:, :OUT, 0].set(a2)
    b2 = jnp.zeros((OP8, 1), jnp.float32)
    return w0, b0, w1, b1, w2, b2


def _reference(t, w0, b0, w1, b1, w2, b2):
    """Plain-JAX reference (reconstructs the math-form matrices)."""
    a0 = w0[:HIDDEN, 0][None, :]
    c0 = b0[:HIDDEN, 0][None, :]
    a1 = w1[:, :HIDDEN, 0]
    c1 = b1[:HIDDEN, 0][None, :]
    a2 = w2[:, :OUT, 0]
    c2 = b2[:OUT, 0][None, :]
    h = jnp.tanh(t @ a0 + c0)
    h = jnp.tanh(h @ a1 + c1)
    return h @ a2 + c2


if __name__ == "__main__":
    params = make_params(seed=100)

    # Example 1: t consistent with the module (a time grid, N ~= len(data)),
    # values drawn deterministically from PRNGKey(0).
    key = jax.random.PRNGKey(0)
    N = 150
    t1 = jax.random.uniform(key, (N, 1), dtype=jnp.float32, maxval=float(N))
    out1 = jax.block_until_ready(state_nn_forward(t1, *params))
    ref1 = _reference(t1, *params)
    assert out1.shape == (N, OUT)
    assert jnp.allclose(out1, ref1, atol=1e-4, rtol=1e-4)

    # Example 2: exercise the multi-step grid + tail-padded path
    # (N not divisible by the tile) with an arange time grid.
    N2 = 700
    t2 = jnp.arange(N2, dtype=jnp.float32).reshape(N2, 1)
    out2 = jax.block_until_ready(state_nn_forward(t2, *params, tm=256))
    ref2 = _reference(t2, *params)
    assert out2.shape == (N2, OUT)
    assert jnp.allclose(out2, ref2, atol=1e-4, rtol=1e-4)

    print("KERNEL_OK")
</pallas_src>

<mosaic_0001>
module attributes {stable_mosaic.version = 11 : i64} {
  func.func @_state_nn_kernel(%arg0: i32, %arg1: memref<1x256xf32, #tpu.memory_space<vmem>>, %arg2: memref<16x1xf32, #tpu.memory_space<vmem>>, %arg3: memref<16x1xf32, #tpu.memory_space<vmem>>, %arg4: memref<10x16x1xf32, #tpu.memory_space<vmem>>, %arg5: memref<16x1xf32, #tpu.memory_space<vmem>>, %arg6: memref<10x8x1xf32, #tpu.memory_space<vmem>>, %arg7: memref<8x1xf32, #tpu.memory_space<vmem>>, %arg8: memref<8x256xf32, #tpu.memory_space<vmem>>) attributes {dimension_semantics = [#tpu.dimension_semantics<parallel>], iteration_bounds = array<i64: 1>, scalar_prefetch = 0 : i64, scratch_operands = 0 : i64, tpu.core_type = #tpu.core_type<tc>, window_params = [{transform_indices = @transform_0, window_bounds = array<i64: 1, 256>}, {pipeline_mode = #tpu.pipeline_mode<synchronous>, transform_indices = @transform_1, window_bounds = array<i64: 16, 1>}, {pipeline_mode = #tpu.pipeline_mode<synchronous>, transform_indices = @transform_2, window_bounds = array<i64: 16, 1>}, {pipeline_mode = #tpu.pipeline_mode<synchronous>, transform_indices = @transform_3, window_bounds = array<i64: 10, 16, 1>}, {pipeline_mode = #tpu.pipeline_mode<synchronous>, transform_indices = @transform_4, window_bounds = array<i64: 16, 1>}, {pipeline_mode = #tpu.pipeline_mode<synchronous>, transform_indices = @transform_5, window_bounds = array<i64: 10, 8, 1>}, {pipeline_mode = #tpu.pipeline_mode<synchronous>, transform_indices = @transform_6, window_bounds = array<i64: 8, 1>}, {transform_indices = @transform_7, window_bounds = array<i64: 8, 256>}]} {
    %c0 = arith.constant 0 : index
    %c0_0 = arith.constant 0 : index
    %0 = vector.load %arg2[%c0, %c0_0] : memref<16x1xf32, #tpu.memory_space<vmem>>, vector<16x1xf32>
    %c0_1 = arith.constant 0 : index
    %c0_2 = arith.constant 0 : index
    %1 = vector.load %arg3[%c0_1, %c0_2] : memref<16x1xf32, #tpu.memory_space<vmem>>, vector<16x1xf32>
    %c0_3 = arith.constant 0 : index
    %c0_4 = arith.constant 0 : index
    %2 = vector.load %arg5[%c0_3, %c0_4] : memref<16x1xf32, #tpu.memory_space<vmem>>, vector<16x1xf32>
    %c0_5 = arith.constant 0 : index
    %c0_6 = arith.constant 0 : index
    %3 = vector.load %arg7[%c0_5, %c0_6] : memref<8x1xf32, #tpu.memory_space<vmem>>, vector<8x1xf32>
    %c0_7 = arith.constant 0 : index
    %c0_8 = arith.constant 0 : index
    %4 = vector.load %arg1[%c0_7, %c0_8] : memref<1x256xf32, #tpu.memory_space<vmem>>, vector<1x256xf32>
    %5 = vector.broadcast %0 : vector<16x1xf32> to vector<16x256xf32>
    %6 = vector.broadcast %4 : vector<1x256xf32> to vector<16x256xf32>
    %7 = arith.mulf %5, %6 : vector<16x256xf32>
    %8 = vector.broadcast %1 : vector<16x1xf32> to vector<16x256xf32>
    %9 = arith.addf %7, %8 : vector<16x256xf32>
    %10 = math.tanh %9 : vector<16x256xf32>
    %c0_9 = arith.constant 0 : index
    %c0_10 = arith.constant 0 : index
    %c0_11 = arith.constant 0 : index
    %11 = vector.load %arg4[%c0_9, %c0_10, %c0_11] : memref<10x16x1xf32, #tpu.memory_space<vmem>>, vector<1x16x1xf32>
    %12 = vector.shape_cast %11 : vector<1x16x1xf32> to vector<16x1xf32>
    %13 = vector.extract_strided_slice %10 {offsets = [0, 0], sizes = [1, 256], strides = [1, 1]} : vector<16x256xf32> to vector<1x256xf32>
    %14 = vector.broadcast %12 : vector<16x1xf32> to vector<16x256xf32>
    %15 = vector.broadcast %13 : vector<1x256xf32> to vector<16x256xf32>
    %16 = arith.mulf %14, %15 : vector<16x256xf32>
    %17 = vector.broadcast %2 : vector<16x1xf32> to vector<16x256xf32>
    %18 = arith.addf %16, %17 : vector<16x256xf32>
    %c1 = arith.constant 1 : index
    %c0_12 = arith.constant 0 : index
    %c0_13 = arith.constant 0 : index
    %19 = vector.load %arg4[%c1, %c0_12, %c0_13] : memref<10x16x1xf32, #tpu.memory_space<vmem>>, vector<1x16x1xf32>
    %20 = vector.shape_cast %19 : vector<1x16x1xf32> to vector<16x1xf32>
    %21 = vector.extract_strided_slice %10 {offsets = [1, 0], sizes = [1, 256], strides = [1, 1]} : vector<16x256xf32> to vector<1x256xf32>
    %22 = vector.broadcast %20 : vector<16x1xf32> to vector<16x256xf32>
    %23 = vector.broadcast %21 : vector<1x256xf32> to vector<16x256xf32>
    %24 = arith.mulf %22, %23 : vector<16x256xf32>
    %25 = arith.addf %18, %24 : vector<16x256xf32>
    %c2 = arith.constant 2 : index
    %c0_14 = arith.constant 0 : index
    %c0_15 = arith.constant 0 : index
    %26 = vector.load %arg4[%c2, %c0_14, %c0_15] : memref<10x16x1xf32, #tpu.memory_space<vmem>>, vector<1x16x1xf32>
    %27 = vector.shape_cast %26 : vector<1x16x1xf32> to vector<16x1xf32>
    %28 = vector.extract_strided_slice %10 {offsets = [2, 0], sizes = [1, 256], strides = [1, 1]} : vector<16x256xf32> to vector<1x256xf32>
    %29 = vector.broadcast %27 : vector<16x1xf32> to vector<16x256xf32>
    %30 = vector.broadcast %28 : vector<1x256xf32> to vector<16x256xf32>
    %31 = arith.mulf %29, %30 : vector<16x256xf32>
    %32 = arith.addf %25, %31 : vector<16x256xf32>
    %c3 = arith.constant 3 : index
    %c0_16 = arith.constant 0 : index
    %c0_17 = arith.constant 0 : index
    %33 = vector.load %arg4[%c3, %c0_16, %c0_17] : memref<10x16x1xf32, #tpu.memory_space<vmem>>, vector<1x16x1xf32>
    %34 = vector.shape_cast %33 : vector<1x16x1xf32> to vector<16x1xf32>
    %35 = vector.extract_strided_slice %10 {offsets = [3, 0], sizes = [1, 256], strides = [1, 1]} : vector<16x256xf32> to vector<1x256xf32>
    %36 = vector.broadcast %34 : vector<16x1xf32> to vector<16x256xf32>
    %37 = vector.broadcast %35 : vector<1x256xf32> to vector<16x256xf32>
    %38 = arith.mulf %36, %37 : vector<16x256xf32>
    %39 = arith.addf %32, %38 : vector<16x256xf32>
    %c4 = arith.constant 4 : index
    %c0_18 = arith.constant 0 : index
    %c0_19 = arith.constant 0 : index
    %40 = vector.load %arg4[%c4, %c0_18, %c0_19] : memref<10x16x1xf32, #tpu.memory_space<vmem>>, vector<1x16x1xf32>
    %41 = vector.shape_cast %40 : vector<1x16x1xf32> to vector<16x1xf32>
    %42 = vector.extract_strided_slice %10 {offsets = [4, 0], sizes = [1, 256], strides = [1, 1]} : vector<16x256xf32> to vector<1x256xf32>
    %43 = vector.broadcast %41 : vector<16x1xf32> to vector<16x256xf32>
    %44 = vector.broadcast %42 : vector<1x256xf32> to vector<16x256xf32>
    %45 = arith.mulf %43, %44 : vector<16x256xf32>
    %46 = arith.addf %39, %45 : vector<16x256xf32>
    %c5 = arith.constant 5 : index
    %c0_20 = arith.constant 0 : index
    %c0_21 = arith.constant 0 : index
    %47 = vector.load %arg4[%c5, %c0_20, %c0_21] : memref<10x16x1xf32, #tpu.memory_space<vmem>>, vector<1x16x1xf32>
    %48 = vector.shape_cast %47 : vector<1x16x1xf32> to vector<16x1xf32>
    %49 = vector.extract_strided_slice %10 {offsets = [5, 0], sizes = [1, 256], strides = [1, 1]} : vector<16x256xf32> to vector<1x256xf32>
    %50 = vector.broadcast %48 : vector<16x1xf32> to vector<16x256xf32>
    %51 = vector.broadcast %49 : vector<1x256xf32> to vector<16x256xf32>
    %52 = arith.mulf %50, %51 : vector<16x256xf32>
    %53 = arith.addf %46, %52 : vector<16x256xf32>
    %c6 = arith.constant 6 : index
    %c0_22 = arith.constant 0 : index
    %c0_23 = arith.constant 0 : index
    %54 = vector.load %arg4[%c6, %c0_22, %c0_23] : memref<10x16x1xf32, #tpu.memory_space<vmem>>, vector<1x16x1xf32>
    %55 = vector.shape_cast %54 : vector<1x16x1xf32> to vector<16x1xf32>
    %56 = vector.extract_strided_slice %10 {offsets = [6, 0], sizes = [1, 256], strides = [1, 1]} : vector<16x256xf32> to vector<1x256xf32>
    %57 = vector.broadcast %55 : vector<16x1xf32> to vector<16x256xf32>
    %58 = vector.broadcast %56 : vector<1x256xf32> to vector<16x256xf32>
    %59 = arith.mulf %57, %58 : vector<16x256xf32>
    %60 = arith.addf %53, %59 : vector<16x256xf32>
    %c7 = arith.constant 7 : index
    %c0_24 = arith.constant 0 : index
    %c0_25 = arith.constant 0 : index
    %61 = vector.load %arg4[%c7, %c0_24, %c0_25] : memref<10x16x1xf32, #tpu.memory_space<vmem>>, vector<1x16x1xf32>
    %62 = vector.shape_cast %61 : vector<1x16x1xf32> to vector<16x1xf32>
    %63 = vector.extract_strided_slice %10 {offsets = [7, 0], sizes = [1, 256], strides = [1, 1]} : vector<16x256xf32> to vector<1x256xf32>
    %64 = vector.broadcast %62 : vector<16x1xf32> to vector<16x256xf32>
    %65 = vector.broadcast %63 : vector<1x256xf32> to vector<16x256xf32>
    %66 = arith.mulf %64, %65 : vector<16x256xf32>
    %67 = arith.addf %60, %66 : vector<16x256xf32>
    %c8 = arith.constant 8 : index
    %c0_26 = arith.constant 0 : index
    %c0_27 = arith.constant 0 : index
    %68 = vector.load %arg4[%c8, %c0_26, %c0_27] : memref<10x16x1xf32, #tpu.memory_space<vmem>>, vector<1x16x1xf32>
    %69 = vector.shape_cast %68 : vector<1x16x1xf32> to vector<16x1xf32>
    %70 = vector.extract_strided_slice %10 {offsets = [8, 0], sizes = [1, 256], strides = [1, 1]} : vector<16x256xf32> to vector<1x256xf32>
    %71 = vector.broadcast %69 : vector<16x1xf32> to vector<16x256xf32>
    %72 = vector.broadcast %70 : vector<1x256xf32> to vector<16x256xf32>
    %73 = arith.mulf %71, %72 : vector<16x256xf32>
    %74 = arith.addf %67, %73 : vector<16x256xf32>
    %c9 = arith.constant 9 : index
    %c0_28 = arith.constant 0 : index
    %c0_29 = arith.constant 0 : index
    %75 = vector.load %arg4[%c9, %c0_28, %c0_29] : memref<10x16x1xf32, #tpu.memory_space<vmem>>, vector<1x16x1xf32>
    %76 = vector.shape_cast %75 : vector<1x16x1xf32> to vector<16x1xf32>
    %77 = vector.extract_strided_slice %10 {offsets = [9, 0], sizes = [1, 256], strides = [1, 1]} : vector<16x256xf32> to vector<1x256xf32>
    %78 = vector.broadcast %76 : vector<16x1xf32> to vector<16x256xf32>
    %79 = vector.broadcast %77 : vector<1x256xf32> to vector<16x256xf32>
    %80 = arith.mulf %78, %79 : vector<16x256xf32>
    %81 = arith.addf %74, %80 : vector<16x256xf32>
    %82 = math.tanh %81 : vector<16x256xf32>
    %c0_30 = arith.constant 0 : index
    %c0_31 = arith.constant 0 : index
    %c0_32 = arith.constant 0 : index
    %83 = vector.load %arg6[%c0_30, %c0_31, %c0_32] : memref<10x8x1xf32, #tpu.memory_space<vmem>>, vector<1x8x1xf32>
    %84 = vector.shape_cast %83 : vector<1x8x1xf32> to vector<8x1xf32>
    %85 = vector.extract_strided_slice %82 {offsets = [0, 0], sizes = [1, 256], strides = [1, 1]} : vector<16x256xf32> to vector<1x256xf32>
    %86 = vector.broadcast %84 : vector<8x1xf32> to vector<8x256xf32>
    %87 = vector.broadcast %85 : vector<1x256xf32> to vector<8x256xf32>
    %88 = arith.mulf %86, %87 : vector<8x256xf32>
    %89 = vector.broadcast %3 : vector<8x1xf32> to vector<8x256xf32>
    %90 = arith.addf %88, %89 : vector<8x256xf32>
    %c1_33 = arith.constant 1 : index
    %c0_34 = arith.constant 0 : index
    %c0_35 = arith.constant 0 : index
    %91 = vector.load %arg6[%c1_33, %c0_34, %c0_35] : memref<10x8x1xf32, #tpu.memory_space<vmem>>, vector<1x8x1xf32>
    %92 = vector.shape_cast %91 : vector<1x8x1xf32> to vector<8x1xf32>
    %93 = vector.extract_strided_slice %82 {offsets = [1, 0], sizes = [1, 256], strides = [1, 1]} : vector<16x256xf32> to vector<1x256xf32>
    %94 = vector.broadcast %92 : vector<8x1xf32> to vector<8x256xf32>
    %95 = vector.broadcast %93 : vector<1x256xf32> to vector<8x256xf32>
    %96 = arith.mulf %94, %95 : vector<8x256xf32>
    %97 = arith.addf %90, %96 : vector<8x256xf32>
    %c2_36 = arith.constant 2 : index
    %c0_37 = arith.constant 0 : index
    %c0_38 = arith.constant 0 : index
    %98 = vector.load %arg6[%c2_36, %c0_37, %c0_38] : memref<10x8x1xf32, #tpu.memory_space<vmem>>, vector<1x8x1xf32>
    %99 = vector.shape_cast %98 : vector<1x8x1xf32> to vector<8x1xf32>
    %100 = vector.extract_strided_slice %82 {offsets = [2, 0], sizes = [1, 256], strides = [1, 1]} : vector<16x256xf32> to vector<1x256xf32>
    %101 = vector.broadcast %99 : vector<8x1xf32> to vector<8x256xf32>
    %102 = vector.broadcast %100 : vector<1x256xf32> to vector<8x256xf32>
    %103 = arith.mulf %101, %102 : vector<8x256xf32>
    %104 = arith.addf %97, %103 : vector<8x256xf32>
    %c3_39 = arith.constant 3 : index
    %c0_40 = arith.constant 0 : index
    %c0_41 = arith.constant 0 : index
    %105 = vector.load %arg6[%c3_39, %c0_40, %c0_41] : memref<10x8x1xf32, #tpu.memory_space<vmem>>, vector<1x8x1xf32>
    %106 = vector.shape_cast %105 : vector<1x8x1xf32> to vector<8x1xf32>
    %107 = vector.extract_strided_slice %82 {offsets = [3, 0], sizes = [1, 256], strides = [1, 1]} : vector<16x256xf32> to vector<1x256xf32>
    %108 = vector.broadcast %106 : vector<8x1xf32> to vector<8x256xf32>
    %109 = vector.broadcast %107 : vector<1x256xf32> to vector<8x256xf32>
    %110 = arith.mulf %108, %109 : vector<8x256xf32>
    %111 = arith.addf %104, %110 : vector<8x256xf32>
    %c4_42 = arith.constant 4 : index
    %c0_43 = arith.constant 0 : index
    %c0_44 = arith.constant 0 : index
    %112 = vector.load %arg6[%c4_42, %c0_43, %c0_44] : memref<10x8x1xf32, #tpu.memory_space<vmem>>, vector<1x8x1xf32>
    %113 = vector.shape_cast %112 : vector<1x8x1xf32> to vector<8x1xf32>
    %114 = vector.extract_strided_slice %82 {offsets = [4, 0], sizes = [1, 256], strides = [1, 1]} : vector<16x256xf32> to vector<1x256xf32>
    %115 = vector.broadcast %113 : vector<8x1xf32> to vector<8x256xf32>
    %116 = vector.broadcast %114 : vector<1x256xf32> to vector<8x256xf32>
    %117 = arith.mulf %115, %116 : vector<8x256xf32>
    %118 = arith.addf %111, %117 : vector<8x256xf32>
    %c5_45 = arith.constant 5 : index
    %c0_46 = arith.constant 0 : index
    %c0_47 = arith.constant 0 : index
    %119 = vector.load %arg6[%c5_45, %c0_46, %c0_47] : memref<10x8x1xf32, #tpu.memory_space<vmem>>, vector<1x8x1xf32>
    %120 = vector.shape_cast %119 : vector<1x8x1xf32> to vector<8x1xf32>
    %121 = vector.extract_strided_slice %82 {offsets = [5, 0], sizes = [1, 256], strides = [1, 1]} : vector<16x256xf32> to vector<1x256xf32>
    %122 = vector.broadcast %120 : vector<8x1xf32> to vector<8x256xf32>
    %123 = vector.broadcast %121 : vector<1x256xf32> to vector<8x256xf32>
    %124 = arith.mulf %122, %123 : vector<8x256xf32>
    %125 = arith.addf %118, %124 : vector<8x256xf32>
    %c6_48 = arith.constant 6 : index
    %c0_49 = arith.constant 0 : index
    %c0_50 = arith.constant 0 : index
    %126 = vector.load %arg6[%c6_48, %c0_49, %c0_50] : memref<10x8x1xf32, #tpu.memory_space<vmem>>, vector<1x8x1xf32>
    %127 = vector.shape_cast %126 : vector<1x8x1xf32> to vector<8x1xf32>
    %128 = vector.extract_strided_slice %82 {offsets = [6, 0], sizes = [1, 256], strides = [1, 1]} : vector<16x256xf32> to vector<1x256xf32>
    %129 = vector.broadcast %127 : vector<8x1xf32> to vector<8x256xf32>
    %130 = vector.broadcast %128 : vector<1x256xf32> to vector<8x256xf32>
    %131 = arith.mulf %129, %130 : vector<8x256xf32>
    %132 = arith.addf %125, %131 : vector<8x256xf32>
    %c7_51 = arith.constant 7 : index
    %c0_52 = arith.constant 0 : index
    %c0_53 = arith.constant 0 : index
    %133 = vector.load %arg6[%c7_51, %c0_52, %c0_53] : memref<10x8x1xf32, #tpu.memory_space<vmem>>, vector<1x8x1xf32>
    %134 = vector.shape_cast %133 : vector<1x8x1xf32> to vector<8x1xf32>
    %135 = vector.extract_strided_slice %82 {offsets = [7, 0], sizes = [1, 256], strides = [1, 1]} : vector<16x256xf32> to vector<1x256xf32>
    %136 = vector.broadcast %134 : vector<8x1xf32> to vector<8x256xf32>
    %137 = vector.broadcast %135 : vector<1x256xf32> to vector<8x256xf32>
    %138 = arith.mulf %136, %137 : vector<8x256xf32>
    %139 = arith.addf %132, %138 : vector<8x256xf32>
    %c8_54 = arith.constant 8 : index
    %c0_55 = arith.constant 0 : index
    %c0_56 = arith.constant 0 : index
    %140 = vector.load %arg6[%c8_54, %c0_55, %c0_56] : memref<10x8x1xf32, #tpu.memory_space<vmem>>, vector<1x8x1xf32>
    %141 = vector.shape_cast %140 : vector<1x8x1xf32> to vector<8x1xf32>
    %142 = vector.extract_strided_slice %82 {offsets = [8, 0], sizes = [1, 256], strides = [1, 1]} : vector<16x256xf32> to vector<1x256xf32>
    %143 = vector.broadcast %141 : vector<8x1xf32> to vector<8x256xf32>
    %144 = vector.broadcast %142 : vector<1x256xf32> to vector<8x256xf32>
    %145 = arith.mulf %143, %144 : vector<8x256xf32>
    %146 = arith.addf %139, %145 : vector<8x256xf32>
    %c9_57 = arith.constant 9 : index
    %c0_58 = arith.constant 0 : index
    %c0_59 = arith.constant 0 : index
    %147 = vector.load %arg6[%c9_57, %c0_58, %c0_59] : memref<10x8x1xf32, #tpu.memory_space<vmem>>, vector<1x8x1xf32>
    %148 = vector.shape_cast %147 : vector<1x8x1xf32> to vector<8x1xf32>
    %149 = vector.extract_strided_slice %82 {offsets = [9, 0], sizes = [1, 256], strides = [1, 1]} : vector<16x256xf32> to vector<1x256xf32>
    %150 = vector.broadcast %148 : vector<8x1xf32> to vector<8x256xf32>
    %151 = vector.broadcast %149 : vector<1x256xf32> to vector<8x256xf32>
    %152 = arith.mulf %150, %151 : vector<8x256xf32>
    %153 = arith.addf %146, %152 : vector<8x256xf32>
    %c0_60 = arith.constant 0 : index
    %c0_61 = arith.constant 0 : index
    %154 = vector.load %arg8[%c0_60, %c0_61] : memref<8x256xf32, #tpu.memory_space<vmem>>, vector<8x256xf32>
    tpu.vector_store %arg8[%c0_60, %c0_61], %153 {strides = array<i32>} : memref<8x256xf32, #tpu.memory_space<vmem>>, vector<8x256xf32>,
    return
  }
  func.func @transform_0(%arg0: i32) -> (i32, i32) {
    %c0_i32 = arith.constant 0 : i32
    %c0_i32_0 = arith.constant 0 : i32
    return %c0_i32, %arg0 : i32, i32
  }
  func.func @transform_1(%arg0: i32) -> (i32, i32) {
    %c0_i32 = arith.constant 0 : i32
    %c0_i32_0 = arith.constant 0 : i32
    %c0_i32_1 = arith.constant 0 : i32
    return %c0_i32, %c0_i32_0 : i32, i32
  }
  func.func @transform_2(%arg0: i32) -> (i32, i32) {
    %c0_i32 = arith.constant 0 : i32
    %c0_i32_0 = arith.constant 0 : i32
    %c0_i32_1 = arith.constant 0 : i32
    return %c0_i32, %c0_i32_0 : i32, i32
  }
  func.func @transform_3(%arg0: i32) -> (i32, i32, i32) {
    %c0_i32 = arith.constant 0 : i32
    %c0_i32_0 = arith.constant 0 : i32
    %c0_i32_1 = arith.constant 0 : i32
    %c0_i32_2 = arith.constant 0 : i32
    return %c0_i32, %c0_i32_0, %c0_i32_1 : i32, i32, i32
  }
  func.func @transform_4(%arg0: i32) -> (i32, i32) {
    %c0_i32 = arith.constant 0 : i32
    %c0_i32_0 = arith.constant 0 : i32
    %c0_i32_1 = arith.constant 0 : i32
    return %c0_i32, %c0_i32_0 : i32, i32
  }
  func.func @transform_5(%arg0: i32) -> (i32, i32, i32) {
    %c0_i32 = arith.constant 0 : i32
    %c0_i32_0 = arith.constant 0 : i32
    %c0_i32_1 = arith.constant 0 : i32
    %c0_i32_2 = arith.constant 0 : i32
    return %c0_i32, %c0_i32_0, %c0_i32_1 : i32, i32, i32
  }
  func.func @transform_6(%arg0: i32) -> (i32, i32) {
    %c0_i32 = arith.constant 0 : i32
    %c0_i32_0 = arith.constant 0 : i32
    %c0_i32_1 = arith.constant 0 : i32
    return %c0_i32, %c0_i32_0 : i32, i32
  }
  func.func @transform_7(%arg0: i32) -> (i32, i32) {
    %c0_i32 = arith.constant 0 : i32
    %c0_i32_0 = arith.constant 0 : i32
    return %c0_i32, %arg0 : i32, i32
  }
}

</mosaic_0001>

<bundles_post_ra>
// kernel: state_nn_forward.1
= control target key start
LH: loop header
LB: loop body
LE: loop exit
PB: predicated region body
PF: predicated region fallthrough
CT: control target
= control target key end

     0   :  { %v501_v0 = vmov 0   ;;  %s722_s3 = inlined_call_operand.vmem [shape: f32[10,16,1], index: 3, kind: input, shape index: {}]   ;;  %s723_s2 = inlined_call_operand.vmem [shape: f32[16,1], index: 2, kind: input, shape index: {}]   ;;  %s724_s1 = inlined_call_operand.vmem [shape: f32[16,1], index: 1, kind: input, shape index: {}]   ;;  %s725_s4 = inlined_call_operand.vmem [shape: f32[16,1], index: 4, kind: input, shape index: {}]   ;;  %s726_s5 = inlined_call_operand.vmem [shape: f32[10,8,1], index: 5, kind: input, shape index: {}]   ;;  %s727_s6 = inlined_call_operand.vmem [shape: f32[8,1], index: 6, kind: input, shape index: {}]   ;;  %s728_s0 = inlined_call_operand.vmem [shape: f32[1,256], index: 0, kind: input, shape index: {}]   ;;  %s729_s7 = inlined_call_operand.vmem [shape: f32[8,256], index: 7, kind: output, shape index: {}]  }
   0x1   :  { %484 = vset.pattern.permute.xlu2 %v501_v0  ;;  %483 = vset.pattern.permute.xlu1 %v501_v0  ;;  %v71_v1 = vld [vmem:[%s722_s3] sm:$0xff]  ;;  %v72_v4 = vld [vmem:[%s722_s3 + $0x8] sm:$0xff]  ;;  %v454_v7 = vld [vmem:[%s722_s3 + $0x10] sm:$0xff] }
   0x2   :  { %v28_v2 = vld [vmem:[%s723_s2] sm:$0xff]  ;;  %482 = vset.pattern.permute.xlu0 %v501_v0  ;;  %75 = vperm.xlu2 %484, %v71_v1   ;;  %v29_v5 = vld [vmem:[%s723_s2 + $0x8] sm:$0xff]  ;;  %v455_v12 = vld [vmem:[%s722_s3 + $0x18] sm:$0xff] }
   0x3   :  { %v26_v3 = vld [vmem:[%s724_s1] sm:$0xff]  ;;  %55 = vperm.xlu1 %483, %v28_v2   ;;  %v27_v6 = vld [vmem:[%s724_s1 + $0x8] sm:$0xff]  ;;  %v459_v14 = vld [vmem:[%s722_s3 + $0x38] sm:$0xff] }
   0x4   :  { %36 = vperm.xlu0 %482, %v26_v3   ;;  %v31_v8 = vld [vmem:[%s725_s4 + $0x8] sm:$0xff]  ;;  %v30_v9 = vld [vmem:[%s725_s4] sm:$0xff]  ;;  %v458_v15 = vld [vmem:[%s722_s3 + $0x30] sm:$0xff] }
   0x5   :  { %v457_v10 = vld [vmem:[%s722_s3 + $0x28] sm:$0xff]  ;;  %v456_v11 = vld [vmem:[%s722_s3 + $0x20] sm:$0xff]  ;;  %v463_v16 = vld [vmem:[%s722_s3 + $0x58] sm:$0xff] }
   0x6   :  { %v460_v13 = vld [vmem:[%s722_s3 + $0x40] sm:$0xff]  ;;  %v462_v17 = vld [vmem:[%s722_s3 + $0x50] sm:$0xff]  ;;  %v461_v18 = vld [vmem:[%s722_s3 + $0x48] sm:$0xff] }
   0x7   :  { %v466_v19 = vld [vmem:[%s722_s3 + $0x70] sm:$0xff]  ;;  %v465_v20 = vld [vmem:[%s722_s3 + $0x68] sm:$0xff]  ;;  %v464_v21 = vld [vmem:[%s722_s3 + $0x60] sm:$0xff] }
   0x8   :  { %v469_v22 = vld [vmem:[%s722_s3 + $0x88] sm:$0xff]  ;;  %v468_v23 = vld [vmem:[%s722_s3 + $0x80] sm:$0xff]  ;;  %v467_v24 = vld [vmem:[%s722_s3 + $0x78] sm:$0xff] }
   0x9   :  { %v314_v25 = vld [vmem:[%s726_s5] sm:$0xff]  ;;  %v471_v26 = vld [vmem:[%s722_s3 + $0x98] sm:$0xff]  ;;  %v470_v27 = vld [vmem:[%s722_s3 + $0x90] sm:$0xff] }
   0xa   :  { %80 = vperm.xlu2 %484, %v72_v4   ;;  %v473_v28 = vld [vmem:[%s726_s5 + $0x10] sm:$0xff]  ;;  %v472_v29 = vld [vmem:[%s726_s5 + $0x8] sm:$0xff]  ;;  %v32_v30 = vld [vmem:[%s727_s6] sm:$0xff] }
   0xb   :  { %60 = vperm.xlu1 %483, %v29_v5   ;;  %v476_v31 = vld [vmem:[%s726_s5 + $0x28] sm:$0xff]  ;;  %v475_v32 = vld [vmem:[%s726_s5 + $0x20] sm:$0xff]  ;;  %v474_v33 = vld [vmem:[%s726_s5 + $0x18] sm:$0xff] }
   0xc   :  { %41 = vperm.xlu0 %482, %v27_v6   ;;  %v479_v34 = vld [vmem:[%s726_s5 + $0x40] sm:$0xff]  ;;  %v478_v35 = vld [vmem:[%s726_s5 + $0x38] sm:$0xff]  ;;  %v477_v36 = vld [vmem:[%s726_s5 + $0x30] sm:$0xff] }
   0xd   :  { %v480_v37 = vld [vmem:[%s726_s5 + $0x48] sm:$0xff]  ;;  %v33_v45 = vld [vmem:[%s728_s0] sm:$0x3] }
   0xe   :  { %v45_v46 = vperm.slane %v33_v45, 0  ;;  %v46_v48 = vperm.slane %v33_v45, 1 }
  0x12   :  { %108 = vperm.xlu2 %484, %v454_v7  }
  0x13   :  { %96 = vperm.xlu1 %483, %v31_v8  }
  0x14   :  { %91 = vperm.xlu0 %482, %v30_v9  }
  0x1a   :  { %136 = vperm.xlu2 %484, %v457_v10  }
  0x1b   :  { %131 = vperm.xlu1 %483, %v456_v11  }
  0x1c   :  { %113 = vperm.xlu0 %482, %v455_v12  }
  0x22   :  { %177 = vperm.xlu2 %484, %v460_v13  }
  0x23   :  { %159 = vperm.xlu1 %483, %v459_v14  }
  0x24   :  { %154 = vperm.xlu0 %482, %v458_v15  }
  0x2a   :  { %205 = vperm.xlu2 %484, %v463_v16  }
  0x2b   :  { %200 = vperm.xlu1 %483, %v462_v17  }
  0x2c   :  { %182 = vperm.xlu0 %482, %v461_v18  }
  0x32   :  { %246 = vperm.xlu2 %484, %v466_v19  }
  0x33   :  { %228 = vperm.xlu1 %483, %v465_v20  }
  0x34   :  { %223 = vperm.xlu0 %482, %v464_v21  }
  0x3a   :  { %274 = vperm.xlu2 %484, %v469_v22  }
  0x3b   :  { %269 = vperm.xlu1 %483, %v468_v23  }
  0x3c   :  { %251 = vperm.xlu0 %482, %v467_v24  }
  0x42   :  { %317 = vperm.xlu2 %484, %v314_v25  }
  0x43   :  { %297 = vperm.xlu1 %483, %v471_v26  }
  0x44   :  { %292 = vperm.xlu0 %482, %v470_v27  }
  0x4a   :  { %348 = vperm.xlu2 %484, %v473_v28  }
  0x4b   :  { %335 = vperm.xlu1 %483, %v472_v29  }
  0x4c   :  { %326 = vperm.xlu0 %482, %v32_v30  }
  0x52   :  { %387 = vperm.xlu2 %484, %v476_v31  }
  0x53   :  { %374 = vperm.xlu1 %483, %v475_v32  }
  0x54   :  { %361 = vperm.xlu0 %482, %v474_v33  }
  0x5a   :  { %426 = vperm.xlu2 %484, %v479_v34  }
  0x5b   :  { %413 = vperm.xlu1 %483, %v478_v35  }
  0x5c   :  { %400 = vperm.xlu0 %482, %v477_v36   ;;  %v76_v38 = vpop.permute.xlu2 %75 }
  0x64   :  { %439 = vperm.xlu0 %482, %v480_v37   ;;  %v653_v39 = vpop.permute.xlu2 %80 }
  0x6c   :  { %v109_v42 = vpop.permute.xlu2 %108 }
  0x74   :  { %v658_v47 = vpop.permute.xlu2 %136 }
  0x75   :  { %v56_v40 = vpop.permute.xlu1 %55 }
  0x76   :  { %v37_v41 = vpop.permute.xlu0 %36 }
  0x77   :  { %v49_v51 = vmul.f32 %v45_v46, %v37_v41  ;;  %v50_v52 = vmul.f32 %v46_v48, %v37_v41 }
  0x79   :  { %v63_v53 = vadd.f32 %v56_v40, %v49_v51  ;;  %v64_v54 = vadd.f32 %v56_v40, %v50_v52 }
  0x7b   :  { %485 = vtanh.f32 %v63_v53 }
  0x7c   :  { %v178_v57 = vpop.permute.xlu2 %177  ;;  %487 = vtanh.f32 %v64_v54 }
  0x7d   :  { %v61_v43 = vpop.permute.xlu1 %60 }
  0x7e   :  { %v42_v44 = vpop.permute.xlu0 %41 }
  0x7f   :  { %v51_v6 = vmul.f32 %v45_v46, %v42_v44  ;;  %v52_v8 = vmul.f32 %v46_v48, %v42_v44 }
  0x81   :  { %v662_v58 = vpop.eup %485  ;;  %v65_v17 = vadd.f32 %v61_v43, %v51_v6  ;;  %v66_v21 = vadd.f32 %v61_v43, %v52_v8 }
  0x82   :  { %v666_v61 = vpop.eup %487  ;;  %v83_v63 = vperm.slane %v662_v58, 0  ;;  %v116_v5 = vperm.slane %v662_v58, 1  ;;  %v139_v10 = vperm.slane %v662_v58, 2  ;;  %v162_v16 = vperm.slane %v662_v58, 3 }
  0x83   :  { %v84_v0 = vperm.slane %v666_v61, 0  ;;  %v117_v7 = vperm.slane %v666_v61, 1  ;;  %v140_v12 = vperm.slane %v666_v61, 2  ;;  %v163_v20 = vperm.slane %v666_v61, 3 }
  0x84   :  { %v668_v62 = vpop.permute.xlu2 %205  ;;  %v85_v1 = vmul.f32 %v83_v63, %v76_v38  ;;  %v118_v13 = vmul.f32 %v116_v5, %v109_v42  ;;  %v185_v28 = vperm.slane %v662_v58, 4  ;;  %v186_v30 = vperm.slane %v666_v61, 4 }
  0x85   :  { %v660_v49 = vpop.permute.xlu1 %96  ;;  %v86_v2 = vmul.f32 %v84_v0, %v76_v38  ;;  %v119_v18 = vmul.f32 %v117_v7, %v109_v42  ;;  %489 = vtanh.f32 %v65_v17  ;;  %v208_v32 = vperm.slane %v662_v58, 5 }
  0x86   :  { %v92_v50 = vpop.permute.xlu0 %91  ;;  %491 = vtanh.f32 %v66_v21  ;;  %v87_v33 = vmul.f32 %v83_v63, %v653_v39  ;;  %v209_v35 = vperm.slane %v666_v61, 5  ;;  %v88_v36 = vmul.f32 %v84_v0, %v653_v39 }
  0x87   :  { %v99_v9 = vadd.f32 %v92_v50, %v85_v1  ;;  %v100_v11 = vadd.f32 %v92_v50, %v86_v2  ;;  %v187_v38 = vmul.f32 %v185_v28, %v178_v57  ;;  %v231_v42 = vperm.slane %v662_v58, 6 }
  0x88   :  { %v188_v43 = vmul.f32 %v186_v30, %v178_v57  ;;  %v232_v46 = vperm.slane %v666_v61, 6  ;;  %v101_v48 = vadd.f32 %v660_v49, %v87_v33  ;;  %v102_v39 = vadd.f32 %v660_v49, %v88_v36 }
  0x89   :  { %v122_v22 = vadd.f32 %v118_v13, %v99_v9  ;;  %v123_v24 = vadd.f32 %v119_v18, %v100_v11  ;;  %v254_v1 = vperm.slane %v662_v58, 7  ;;  %v255_v2 = vperm.slane %v666_v61, 7 }
  0x8a   :  { %v143_v6 = vmul.f32 %v139_v10, %v658_v47  ;;  %v144_v9 = vmul.f32 %v140_v12, %v658_v47  ;;  %v212_v36 = vmul.f32 %v208_v32, %v668_v62 }
  0x8b   :  { %v695_v53 = vpop.eup %489 }
  0x8c   :  { %v678_v14 = vpop.permute.xlu2 %246  ;;  %v492_v0 = vpop.eup %491  ;;  %v300_v47 = vperm.slane %v695_v53, 1 }
  0x8d   :  { %v132_v55 = vpop.permute.xlu1 %131  ;;  %v278_v11 = vperm.slane %v492_v0, 0  ;;  %v256_v17 = vmul.f32 %v254_v1, %v678_v14 }
  0x8e   :  { %v114_v56 = vpop.permute.xlu0 %113  ;;  %v141_v15 = vmul.f32 %v139_v10, %v132_v55  ;;  %v142_v19 = vmul.f32 %v140_v12, %v132_v55  ;;  %v301_v12 = vperm.slane %v492_v0, 1 }
  0x8f   :  { %v120_v40 = vmul.f32 %v116_v5, %v114_v56  ;;  %v121_v44 = vmul.f32 %v117_v7, %v114_v56  ;;  %v277_v7 = vperm.slane %v695_v53, 0 }
  0x90   :  { %v145_v29 = vadd.f32 %v141_v15, %v122_v22  ;;  %v146_v31 = vadd.f32 %v142_v19, %v123_v24  ;;  %v257_v19 = vmul.f32 %v255_v2, %v678_v14 }
  0x91   :  { %v124_v57 = vadd.f32 %v120_v40, %v101_v48 }
  0x93   :  { %v147_v58 = vadd.f32 %v143_v6, %v124_v57 }
  0x94   :  { %v693_v50 = vpop.permute.xlu2 %274 }
  0x95   :  { %v664_v59 = vpop.permute.xlu1 %159 }
  0x96   :  { %v155_v60 = vpop.permute.xlu0 %154  ;;  %v166_v8 = vmul.f32 %v162_v16, %v664_v59  ;;  %v167_v13 = vmul.f32 %v163_v20, %v664_v59 }
  0x97   :  { %v164_v23 = vmul.f32 %v162_v16, %v155_v60  ;;  %v165_v25 = vmul.f32 %v163_v20, %v155_v60 }
  0x98   :  { %v170_v16 = vadd.f32 %v166_v8, %v147_v58 }
  0x99   :  { %v168_v34 = vadd.f32 %v164_v23, %v145_v29  ;;  %v169_v37 = vadd.f32 %v165_v25, %v146_v31 }
  0x9b   :  { %v191_v51 = vadd.f32 %v187_v38, %v168_v34  ;;  %v192_v54 = vadd.f32 %v188_v43, %v169_v37  ;;  %v213_v37 = vmul.f32 %v209_v35, %v668_v62  ;;  %v282_v62 = vmul.f32 %v278_v11, %v693_v50 }
  0x9d   :  { %v201_v3 = vpop.permute.xlu1 %200 }
  0x9e   :  { %v672_v4 = vpop.permute.xlu0 %182  ;;  %v210_v41 = vmul.f32 %v208_v32, %v201_v3  ;;  %v211_v45 = vmul.f32 %v209_v35, %v201_v3  ;;  %v125_v3 = vadd.f32 %v121_v44, %v102_v39 }
  0x9f   :  { %v189_v61 = vmul.f32 %v185_v28, %v672_v4  ;;  %v190_v21 = vmul.f32 %v186_v30, %v672_v4 }
  0xa0   :  { %v214_v56 = vadd.f32 %v210_v41, %v191_v51  ;;  %v215_v5 = vadd.f32 %v211_v45, %v192_v54  ;;  %v148_v10 = vadd.f32 %v144_v9, %v125_v3 }
  0xa1   :  { %v193_v29 = vadd.f32 %v189_v61, %v170_v16 }
  0xa2   :  { %v171_v24 = vadd.f32 %v167_v13, %v148_v10 }
  0xa3   :  { %v216_v41 = vadd.f32 %v212_v36, %v193_v29 }
  0xa4   :  { %v194_v34 = vadd.f32 %v190_v21, %v171_v24 }
  0xa5   :  { %v682_v26 = vpop.permute.xlu1 %228 }
  0xa6   :  { %v224_v27 = vpop.permute.xlu0 %223  ;;  %v235_v4 = vmul.f32 %v231_v42, %v682_v26  ;;  %v236_v38 = vmul.f32 %v232_v46, %v682_v26  ;;  %v217_v44 = vadd.f32 %v213_v37, %v194_v34 }
  0xa7   :  { %v233_v52 = vmul.f32 %v231_v42, %v224_v27  ;;  %v234_v55 = vmul.f32 %v232_v46, %v224_v27  ;;  %v318_v27 = vpop.permute.xlu2 %317  ;;  %v281_v42 = vmul.f32 %v277_v7, %v693_v50 }
  0xa8   :  { %v239_v48 = vadd.f32 %v235_v4, %v216_v41  ;;  %v240_v51 = vadd.f32 %v236_v38, %v217_v44 }
  0xa9   :  { %v237_v49 = vadd.f32 %v233_v52, %v214_v56  ;;  %v238_v15 = vadd.f32 %v234_v55, %v215_v5 }
  0xab   :  { %v260_v23 = vadd.f32 %v256_v17, %v237_v49  ;;  %v261_v59 = vadd.f32 %v257_v19, %v238_v15 }
  0xad   :  { %v270_v60 = vpop.permute.xlu1 %269 }
  0xae   :  { %v252_v63 = vpop.permute.xlu0 %251  ;;  %v279_v18 = vmul.f32 %v277_v7, %v270_v60  ;;  %v280_v22 = vmul.f32 %v278_v11, %v270_v60 }
  0xaf   :  { %v258_v43 = vmul.f32 %v254_v1, %v252_v63  ;;  %v259_v45 = vmul.f32 %v255_v2, %v252_v63  ;;  %v349_v54 = vpop.permute.xlu2 %348 }
  0xb0   :  { %v283_v31 = vadd.f32 %v279_v18, %v260_v23  ;;  %v284_v14 = vadd.f32 %v280_v22, %v261_v59 }
  0xb1   :  { %v262_v39 = vadd.f32 %v258_v43, %v239_v48  ;;  %v263_v32 = vadd.f32 %v259_v45, %v240_v51 }
  0xb3   :  { %v285_v46 = vadd.f32 %v281_v42, %v262_v39  ;;  %v286_v0 = vadd.f32 %v282_v62, %v263_v32 }
  0xb5   :  { %v298_v20 = vpop.permute.xlu1 %297 }
  0xb6   :  { %v293_v25 = vpop.permute.xlu0 %292  ;;  %v304_v55 = vmul.f32 %v300_v47, %v298_v20  ;;  %v305_v26 = vmul.f32 %v301_v12, %v298_v20 }
  0xb7   :  { %v302_v28 = vmul.f32 %v300_v47, %v293_v25  ;;  %v303_v33 = vmul.f32 %v301_v12, %v293_v25  ;;  %v388_v18 = vpop.permute.xlu2 %387 }
  0xb8   :  { %v308_v56 = vadd.f32 %v304_v55, %v285_v46  ;;  %v309_v3 = vadd.f32 %v305_v26, %v286_v0 }
  0xb9   :  { %v306_v30 = vadd.f32 %v302_v28, %v283_v31  ;;  %v307_v40 = vadd.f32 %v303_v33, %v284_v14 }
  0xbb   :  { %493 = vtanh.f32 %v306_v30 }
  0xbc   :  { %495 = vtanh.f32 %v307_v40 }
  0xbd   :  { %v336_v52 = vpop.permute.xlu1 %335  ;;  %497 = vtanh.f32 %v308_v56 }
  0xbe   :  { %v327_v53 = vpop.permute.xlu0 %326  ;;  %499 = vtanh.f32 %v309_v3 }
  0xbf   :  { %v427_v42 = vpop.permute.xlu2 %426 }
  0xc1   :  { %v494_v35 = vpop.eup %493 }
  0xc2   :  { %v496_v60 = vpop.eup %495  ;;  %v338_v63 = vperm.slane %v494_v35, 1  ;;  %v320_v57 = vperm.slane %v494_v35, 0  ;;  %v351_v8 = vperm.slane %v494_v35, 2  ;;  %v364_v61 = vperm.slane %v494_v35, 3 }
  0xc3   :  { %v339_v1 = vperm.slane %v496_v60, 1  ;;  %v321_v2 = vperm.slane %v496_v60, 0  ;;  %v352_v9 = vperm.slane %v496_v60, 2  ;;  %v365_v21 = vperm.slane %v496_v60, 3  ;;  %v498_v28 = vpop.eup %497 }
  0xc4   :  { %v322_v5 = vmul.f32 %v320_v57, %v318_v27  ;;  %v340_v13 = vmul.f32 %v338_v63, %v336_v52  ;;  %v353_v58 = vmul.f32 %v351_v8, %v349_v54  ;;  %v377_v22 = vperm.slane %v494_v35, 4  ;;  %v500_v36 = vpop.eup %499 }
  0xc5   :  { %v323_v49 = vmul.f32 %v321_v2, %v318_v27  ;;  %v375_v7 = vpop.permute.xlu1 %374  ;;  %v341_v50 = vmul.f32 %v339_v1, %v336_v52  ;;  %v354_v10 = vmul.f32 %v352_v9, %v349_v54  ;;  %v390_v47 = vperm.slane %v494_v35, 5 }
  0xc6   :  { %v362_v6 = vpop.permute.xlu0 %361  ;;  %v329_v15 = vadd.f32 %v327_v53, %v322_v5  ;;  %v378_v12 = vperm.slane %v496_v60, 4  ;;  %v391_v20 = vperm.slane %v496_v60, 5  ;;  %v379_v25 = vmul.f32 %v377_v22, %v375_v7 }
  0xc7   :  { %v330_v11 = vadd.f32 %v327_v53, %v323_v49  ;;  %v366_v23 = vmul.f32 %v364_v61, %v362_v6  ;;  %v367_v59 = vmul.f32 %v365_v21, %v362_v6  ;;  %v403_v31 = vperm.slane %v494_v35, 6 }
  0xc8   :  { %v342_v17 = vadd.f32 %v340_v13, %v329_v15  ;;  %v380_v33 = vmul.f32 %v378_v12, %v375_v7  ;;  %v404_v14 = vperm.slane %v496_v60, 6  ;;  %v392_v30 = vmul.f32 %v390_v47, %v388_v18 }
  0xc9   :  { %v343_v19 = vadd.f32 %v341_v50, %v330_v11  ;;  %v393_v41 = vmul.f32 %v391_v20, %v388_v18  ;;  %v416_v44 = vperm.slane %v494_v35, 7  ;;  %v429_v48 = vperm.slane %v498_v28, 0 }
  0xca   :  { %v355_v16 = vadd.f32 %v353_v58, %v342_v17  ;;  %v417_v51 = vperm.slane %v496_v60, 7  ;;  %v430_v53 = vperm.slane %v500_v36, 0  ;;  %v442_v62 = vperm.slane %v498_v28, 1 }
  0xcb   :  { %v356_v24 = vadd.f32 %v354_v10, %v343_v19  ;;  %v443_v26 = vperm.slane %v500_v36, 1  ;;  %v431_v63 = vmul.f32 %v429_v48, %v427_v42 }
  0xcc   :  { %v368_v27 = vadd.f32 %v366_v23, %v355_v16  ;;  %v432_v56 = vmul.f32 %v430_v53, %v427_v42 }
  0xcd   :  { %v369_v34 = vadd.f32 %v367_v59, %v356_v24  ;;  %v414_v40 = vpop.permute.xlu1 %413 }
  0xce   :  { %v401_v29 = vpop.permute.xlu0 %400  ;;  %v381_v4 = vadd.f32 %v379_v25, %v368_v27  ;;  %v418_v39 = vmul.f32 %v416_v44, %v414_v40  ;;  %v419_v54 = vmul.f32 %v417_v51, %v414_v40 }
  0xcf   :  { %v405_v37 = vmul.f32 %v403_v31, %v401_v29  ;;  %v382_v38 = vadd.f32 %v380_v33, %v369_v34  ;;  %v406_v43 = vmul.f32 %v404_v14, %v401_v29 }
  0xd0   :  { %v394_v45 = vadd.f32 %v392_v30, %v381_v4 }
  0xd1   :  { %v395_v52 = vadd.f32 %v393_v41, %v382_v38 }
  0xd2   :  { %v407_v32 = vadd.f32 %v405_v37, %v394_v45 }
  0xd3   :  { %v408_v55 = vadd.f32 %v406_v43, %v395_v52 }
  0xd4   :  { %v420_v46 = vadd.f32 %v418_v39, %v407_v32 }
  0xd5   :  { %v421_v57 = vadd.f32 %v419_v54, %v408_v55 }
  0xd6   :  { %v440_v0 = vpop.permute.xlu0 %439  ;;  %v433_v35 = vadd.f32 %v431_v63, %v420_v46 }
  0xd7   :  { %v444_v1 = vmul.f32 %v442_v62, %v440_v0  ;;  %v445_v2 = vmul.f32 %v443_v26, %v440_v0  ;;  %v434_v3 = vadd.f32 %v432_v56, %v421_v57 }
  0xd9   :  { %v446_v5 = vadd.f32 %v444_v1, %v433_v35  ;;  %v447_v60 = vadd.f32 %v445_v2, %v434_v3 }
  0xdb   :  { %448 = vst [vmem:[%s729_s7] sm:$0xff] %v446_v5 }
  0xdc   :  { %449 = vst [vmem:[%s729_s7 + $0x8] sm:$0xff] %v447_v60 }

</bundles_post_ra>
